<compile_context>
chip_gen: v5e
topology: v5e:2x2
jax: 0.10.0
libtpu: 0.0.40
codegen_flags: <defaults>
</compile_context>

<pallas_src>
import jax
import jax.numpy as jnp
from jax.experimental import pallas as pl
from jax.experimental.pallas import tpu as pltpu


def _conv3x3_bias_relu_kernel(x_ref, w_ref, b_ref, o_ref):
    """One (batch, row-tile) grid step: 3x3 conv (padding=1) + bias + ReLU.

    x_ref : (TH+2, W, 3*Cin)  bf16  kx-unfolded, zero-padded row window
                                    (interior rows + both halo rows)
    w_ref : (3, 3*Cin, Cout)  bf16  per-ky weight slabs, K index = kx*Cin + c
    w_ref : b_ref (1, Cout)   f32   bias
    o_ref : (TH, W, Cout)     f32   output tile (exact channels, no padding)
    """
    THp2, W, K = x_ref.shape
    TH = THp2 - 2
    Cout = o_ref.shape[-1]

    # 3 MXU matmuls with K = 3*Cin, f32 accumulation.  ky row-windows are
    # slices of the 3rd-from-last dim (no sublane/lane relayout) and the
    # (TH, W, K) -> (TH*W, K) reshape is layout-preserving for W % 8 == 0.
    acc = jnp.dot(x_ref[0:TH].reshape(TH * W, K), w_ref[0],
                  preferred_element_type=jnp.float32)
    for ky in (1, 2):
        acc = acc + jnp.dot(x_ref[ky:ky + TH].reshape(TH * W, K), w_ref[ky],
                            preferred_element_type=jnp.float32)

    # Bias + ReLU on the f32 accumulator; store only the real channels.
    acc = jnp.maximum(acc + b_ref[...], 0.0)
    o_ref[...] = acc.reshape(TH, W, Cout).astype(o_ref.dtype)


def _pick_tile_h(H, W, c_in, c_out, n_batch, budget_bytes):
    """Largest divisor TH of H whose per-step tiles fit the VMEM budget."""
    def footprint(th):
        x_bytes = (th + 2) * W * (3 * c_in) * 2   # bf16 input window
        o_bytes = th * W * c_out * 4              # f32 output tile
        acc_bytes = th * W * c_out * 4            # in-kernel f32 accumulator
        return 2 * (x_bytes + o_bytes) + acc_bytes  # 2x: double buffering

    divisors = [d for d in range(1, H + 1) if H % d == 0]
    fitting = [d for d in divisors if footprint(d) <= budget_bytes]
    th = max(fitting) if fitting else 1
    # v7x has 2 TensorCores: keep the (batch, row-tile) grid non-degenerate.
    if n_batch == 1 and th == H:
        smaller = [d for d in fitting if d < H]
        if smaller:
            th = max(smaller)
    return th


def conv_block_forward(x_nchw, conv_weights, conv_biases, *,
                       vmem_tile_budget_bytes=6 << 20):
    """Forward of conv_block: ReLU(conv_{n-1}(input)).  x_nchw: (N,Cin,H,W) f32."""
    w = conv_weights[-1]          # (Cout, Cin, 3, 3) — only the last conv survives
    b = conv_biases[-1]           # (Cout,)

    N, Cin, H, W = x_nchw.shape
    Cout = w.shape[0]

    TH = _pick_tile_h(H, W, Cin, Cout, N, vmem_tile_budget_bytes)
    n_tiles = H // TH

    # ---- wrapper layout plumbing (one fused XLA pass over the activation) --
    # NCHW -> NHWC, bf16 MXU inputs, zero-pad H and W by 1.
    x_nhwc = jnp.transpose(x_nchw, (0, 2, 3, 1)).astype(jnp.bfloat16)
    x_pad = jnp.pad(x_nhwc, ((0, 0), (1, 1), (1, 1), (0, 0)))   # (N,H+2,W+2,Cin)
    # kx-unfold: channel index becomes kx*Cin + c so the kernel contracts 3*Cin.
    x3 = jnp.concatenate([x_pad[:, :, kx:kx + W, :] for kx in range(3)], axis=-1)
    # Overlapping (TH+2)-row windows -> a single input operand per grid step
    # (only the 2 halo rows per tile are duplicated; identity when n_tiles==1).
    row_idx = jnp.arange(n_tiles)[:, None] * TH + jnp.arange(TH + 2)[None, :]
    x_win = jnp.take(x3, row_idx, axis=1)          # (N, n_tiles, TH+2, W, 3*Cin)

    # (Cout, Cin, 3, 3) -> (ky, kx*Cin + c, Cout), bf16 for the MXU.
    w_k = jnp.transpose(w, (2, 3, 1, 0)).reshape(3, 3 * Cin, Cout).astype(jnp.bfloat16)
    b2 = b.reshape(1, Cout).astype(jnp.float32)

    cost = pl.CostEstimate(
        flops=2 * N * H * W * 9 * Cin * Cout,
        transcendentals=0,
        bytes_accessed=(x_win.size * 2 + w_k.size * 2 + b2.size * 4
                        + N * H * W * Cout * 4))

    out_nhwc = pl.pallas_call(
        _conv3x3_bias_relu_kernel,
        out_shape=jax.ShapeDtypeStruct((N, H, W, Cout), jnp.float32),
        grid=(N, n_tiles),
        in_specs=[
            # single fetch per step: interior rows + both halo rows
            pl.BlockSpec((None, None, TH + 2, W, 3 * Cin),
                         lambda n, t: (n, t, 0, 0, 0)),
            # grid-invariant weights/bias (tiny here; at real UNet channel
            # counts use pipeline_mode=pl.Buffered(1) and a 256-wide Cout axis)
            pl.BlockSpec((3, 3 * Cin, Cout), lambda n, t: (0, 0, 0)),
            pl.BlockSpec((1, Cout), lambda n, t: (0, 0)),
        ],
        out_specs=pl.BlockSpec((None, TH, W, Cout), lambda n, t: (n, t, 0, 0)),
        compiler_params=pltpu.CompilerParams(
            dimension_semantics=("parallel", "parallel")),
        cost_estimate=cost,
    )(x_win, w_k, b2)

    # PyTorch layout: NHWC -> NCHW over the compact (un-padded) f32 output.
    return jnp.transpose(out_nhwc, (0, 3, 1, 2))


def init_conv_block_params(key, in_channels, feat_dim, n_convs=2):
    """Deterministic parameter init matching Conv2d(in, feat, 3, padding=1) shapes."""
    weights, biases = [], []
    for _ in range(n_convs):
        kw, kb, key = jax.random.split(key, 3)
        fan_in = in_channels * 3 * 3
        bound = 1.0 / jnp.sqrt(fan_in)
        weights.append(jax.random.uniform(
            kw, (feat_dim, in_channels, 3, 3), jnp.float32, -bound, bound))
        biases.append(jax.random.uniform(
            kb, (feat_dim,), jnp.float32, -bound, bound))
    return weights, biases


def _reference_forward(x_nchw, conv_weights, conv_biases):
    """Pure-JAX reference of the PyTorch forward: ReLU(conv_last(input)).

    Inputs are rounded to bf16 exactly like the kernel's MXU inputs, so the
    comparison isolates kernel correctness from the intentional bf16 cast.
    """
    w, b = conv_weights[-1], conv_biases[-1]
    xq = x_nchw.astype(jnp.bfloat16).astype(jnp.float32)
    wq = w.astype(jnp.bfloat16).astype(jnp.float32)
    y = jax.lax.conv_general_dilated(
        xq, wq, window_strides=(1, 1), padding=((1, 1), (1, 1)),
        dimension_numbers=("NCHW", "OIHW", "NCHW"),
        preferred_element_type=jnp.float32)
    y = y + b[None, :, None, None]
    return jnp.maximum(y, 0.0)


if __name__ == "__main__":
    key = jax.random.PRNGKey(0)
    kx_, kp = jax.random.split(key)

    N, Cin, H, W = 2, 4, 16, 16
    feat_dim = 8
    x = jax.random.normal(kx_, (N, Cin, H, W), jnp.float32)

    weights, biases = init_conv_block_params(kp, Cin, feat_dim, n_convs=2)

    out = conv_block_forward(x, weights, biases)
    out = jax.block_until_ready(out)

    ref = _reference_forward(x, weights, biases)
    assert out.shape == (N, feat_dim, H, W)
    assert jnp.allclose(out, ref, atol=2e-3, rtol=2e-3), "mismatch vs reference"

    print("KERNEL_OK")
</pallas_src>

<mosaic_0001>
module attributes {stable_mosaic.version = 11 : i64} {
  func.func @_conv3x3_bias_relu_kernel(%arg0: i32, %arg1: i32, %arg2: memref<1x1x18x16x12xbf16, #tpu.memory_space<vmem>>, %arg3: memref<3x12x8xbf16, #tpu.memory_space<vmem>>, %arg4: memref<1x8xf32, #tpu.memory_space<vmem>>, %arg5: memref<1x16x16x8xf32, #tpu.memory_space<vmem>>) attributes {dimension_semantics = [#tpu.dimension_semantics<parallel>, #tpu.dimension_semantics<parallel>], iteration_bounds = array<i64: 2, 1>, scalar_prefetch = 0 : i64, scratch_operands = 0 : i64, tpu.core_type = #tpu.core_type<tc>, window_params = [{transform_indices = @transform_0, window_bounds = array<i64: 1, 1, 18, 16, 12>}, {pipeline_mode = #tpu.pipeline_mode<synchronous>, transform_indices = @transform_1, window_bounds = array<i64: 3, 12, 8>}, {pipeline_mode = #tpu.pipeline_mode<synchronous>, transform_indices = @transform_2, window_bounds = array<i64: 1, 8>}, {transform_indices = @transform_3, window_bounds = array<i64: 1, 16, 16, 8>}]} {
    %c0 = arith.constant 0 : index
    %c0_0 = arith.constant 0 : index
    %c0_1 = arith.constant 0 : index
    %c0_2 = arith.constant 0 : index
    %c0_3 = arith.constant 0 : index
    %0 = vector.load %arg2[%c0, %c0_0, %c0_1, %c0_2, %c0_3] : memref<1x1x18x16x12xbf16, #tpu.memory_space<vmem>>, vector<1x1x16x16x12xbf16>
    %1 = vector.shape_cast %0 : vector<1x1x16x16x12xbf16> to vector<16x16x12xbf16>
    %2 = vector.shape_cast %1 : vector<16x16x12xbf16> to vector<256x12xbf16>
    %c0_4 = arith.constant 0 : index
    %c0_5 = arith.constant 0 : index
    %c0_6 = arith.constant 0 : index
    %3 = vector.load %arg3[%c0_4, %c0_5, %c0_6] : memref<3x12x8xbf16, #tpu.memory_space<vmem>>, vector<1x12x8xbf16>
    %4 = vector.shape_cast %3 : vector<1x12x8xbf16> to vector<12x8xbf16>
    %cst = arith.constant dense<0.000000e+00> : vector<256x8xf32>
    %5 = tpu.matmul %2, %4, %cst {dimension_numbers = #tpu.dot_dimension_numbers<[1], [0], [0], [1], [0, 0, 1, 1], [], []>} : vector<256x12xbf16>, vector<12x8xbf16>, vector<256x8xf32> -> vector<256x8xf32>
    %c0_7 = arith.constant 0 : index
    %c0_8 = arith.constant 0 : index
    %c1 = arith.constant 1 : index
    %c0_9 = arith.constant 0 : index
    %c0_10 = arith.constant 0 : index
    %6 = vector.load %arg2[%c0_7, %c0_8, %c1, %c0_9, %c0_10] : memref<1x1x18x16x12xbf16, #tpu.memory_space<vmem>>, vector<1x1x16x16x12xbf16>
    %7 = vector.shape_cast %6 : vector<1x1x16x16x12xbf16> to vector<16x16x12xbf16>
    %8 = vector.shape_cast %7 : vector<16x16x12xbf16> to vector<256x12xbf16>
    %c1_11 = arith.constant 1 : index
    %c0_12 = arith.constant 0 : index
    %c0_13 = arith.constant 0 : index
    %9 = vector.load %arg3[%c1_11, %c0_12, %c0_13] : memref<3x12x8xbf16, #tpu.memory_space<vmem>>, vector<1x12x8xbf16>
    %10 = vector.shape_cast %9 : vector<1x12x8xbf16> to vector<12x8xbf16>
    %cst_14 = arith.constant dense<0.000000e+00> : vector<256x8xf32>
    %11 = tpu.matmul %8, %10, %cst_14 {dimension_numbers = #tpu.dot_dimension_numbers<[1], [0], [0], [1], [0, 0, 1, 1], [], []>} : vector<256x12xbf16>, vector<12x8xbf16>, vector<256x8xf32> -> vector<256x8xf32>
    %12 = arith.addf %5, %11 : vector<256x8xf32>
    %c0_15 = arith.constant 0 : index
    %c0_16 = arith.constant 0 : index
    %c2 = arith.constant 2 : index
    %c0_17 = arith.constant 0 : index
    %c0_18 = arith.constant 0 : index
    %13 = vector.load %arg2[%c0_15, %c0_16, %c2, %c0_17, %c0_18] : memref<1x1x18x16x12xbf16, #tpu.memory_space<vmem>>, vector<1x1x16x16x12xbf16>
    %14 = vector.shape_cast %13 : vector<1x1x16x16x12xbf16> to vector<16x16x12xbf16>
    %15 = vector.shape_cast %14 : vector<16x16x12xbf16> to vector<256x12xbf16>
    %c2_19 = arith.constant 2 : index
    %c0_20 = arith.constant 0 : index
    %c0_21 = arith.constant 0 : index
    %16 = vector.load %arg3[%c2_19, %c0_20, %c0_21] : memref<3x12x8xbf16, #tpu.memory_space<vmem>>, vector<1x12x8xbf16>
    %17 = vector.shape_cast %16 : vector<1x12x8xbf16> to vector<12x8xbf16>
    %cst_22 = arith.constant dense<0.000000e+00> : vector<256x8xf32>
    %18 = tpu.matmul %15, %17, %cst_22 {dimension_numbers = #tpu.dot_dimension_numbers<[1], [0], [0], [1], [0, 0, 1, 1], [], []>} : vector<256x12xbf16>, vector<12x8xbf16>, vector<256x8xf32> -> vector<256x8xf32>
    %19 = arith.addf %12, %18 : vector<256x8xf32>
    %c0_23 = arith.constant 0 : index
    %c0_24 = arith.constant 0 : index
    %20 = vector.load %arg4[%c0_23, %c0_24] : memref<1x8xf32, #tpu.memory_space<vmem>>, vector<1x8xf32>
    %21 = vector.broadcast %20 : vector<1x8xf32> to vector<256x8xf32>
    %22 = arith.addf %19, %21 : vector<256x8xf32>
    %cst_25 = arith.constant 0.000000e+00 : f32
    %23 = vector.broadcast %cst_25 : f32 to vector<256x8xf32>
    %24 = arith.maximumf %22, %23 : vector<256x8xf32>
    %25 = vector.shape_cast %24 : vector<256x8xf32> to vector<16x16x8xf32>
    %c0_26 = arith.constant 0 : index
    %c0_27 = arith.constant 0 : index
    %c0_28 = arith.constant 0 : index
    %c0_29 = arith.constant 0 : index
    %26 = vector.load %arg5[%c0_26, %c0_27, %c0_28, %c0_29] : memref<1x16x16x8xf32, #tpu.memory_space<vmem>>, vector<1x16x16x8xf32>
    %27 = vector.shape_cast %26 : vector<1x16x16x8xf32> to vector<16x16x8xf32>
    %28 = vector.shape_cast %25 : vector<16x16x8xf32> to vector<1x16x16x8xf32>
    tpu.vector_store %arg5[%c0_26, %c0_27, %c0_28, %c0_29], %28 {strides = array<i32>} : memref<1x16x16x8xf32, #tpu.memory_space<vmem>>, vector<1x16x16x8xf32>,
    return
  }
  func.func @transform_0(%arg0: i32, %arg1: i32) -> (i32, i32, i32, i32, i32) {
    %c0_i32 = arith.constant 0 : i32
    %c0_i32_0 = arith.constant 0 : i32
    %c0_i32_1 = arith.constant 0 : i32
    %c0_i32_2 = arith.constant 0 : i32
    return %arg0, %arg1, %c0_i32, %c0_i32_0, %c0_i32_1 : i32, i32, i32, i32, i32
  }
  func.func @transform_1(%arg0: i32, %arg1: i32) -> (i32, i32, i32) {
    %c0_i32 = arith.constant 0 : i32
    %c0_i32_0 = arith.constant 0 : i32
    %c0_i32_1 = arith.constant 0 : i32
    %c0_i32_2 = arith.constant 0 : i32
    return %c0_i32, %c0_i32_0, %c0_i32_1 : i32, i32, i32
  }
  func.func @transform_2(%arg0: i32, %arg1: i32) -> (i32, i32) {
    %c0_i32 = arith.constant 0 : i32
    %c0_i32_0 = arith.constant 0 : i32
    %c0_i32_1 = arith.constant 0 : i32
    return %c0_i32, %c0_i32_0 : i32, i32
  }
  func.func @transform_3(%arg0: i32, %arg1: i32) -> (i32, i32, i32, i32) {
    %c0_i32 = arith.constant 0 : i32
    %c0_i32_0 = arith.constant 0 : i32
    %c0_i32_1 = arith.constant 0 : i32
    return %arg0, %arg1, %c0_i32, %c0_i32_0 : i32, i32, i32, i32
  }
}

</mosaic_0001>

<bundles_post_ra>
// kernel: tpu_custom_call.1
= control target key start
LH: loop header
LB: loop body
LE: loop exit
PB: predicated region body
PF: predicated region fallthrough
CT: control target
= control target key end

     0   :  { %s1678_s12 = smov 0   ;;  %s1680_s13 = smov 0   ;;  %s1985_s0 = inlined_call_operand.vmem [shape: bf16[2,1,18,16,12], index: 0, kind: input, shape index: {}]   ;;  %s1986_s1 = inlined_call_operand.vmem [shape: bf16[3,12,8], index: 1, kind: input, shape index: {}]   ;;  %s1987_s2 = inlined_call_operand.vmem [shape: f32[1,8], index: 2, kind: input, shape index: {}]   ;;  %s1988_s3 = inlined_call_operand.vmem [shape: f32[2,16,16,8], index: 3, kind: output, shape index: {}]  }
   0x1   :  { %s1682_s14 = smov 0  }
   0x2 LB: > { %s25_s15 = sadd.s32 1, %s1652_s13  ;;  %p1227_p0 = scmp.ge.s32.totalorder %s1656_s14, 1  ;;  %s1656_s14 = sphi %s1682_s14, %s13_s14   ;;  %s1652_s13 = sphi %s1680_s13, %s1990_s13   ;;  %s1648_s12 = sphi %s1678_s12, %s1989_s12  }
   0x3   : > { %p27_p1 = scmp.ge.s32.totalorder %s25_s15, 2  ;;  %p157_p2 = scmp.lt.s32.totalorder %s1656_s14, 3 }
   0x5   : > { %s1992_s15 = smov (%p27_p1, %s25_s15), 0  ;;  %p158_p3 = pnand %p1227_p0, %p157_p2 }
   0x6   : > { %p190_p4 = scmp.lt.s32.totalorder (!%p158_p3), %s1648_s12, 1 }
   0x7   : > { %161 = sbr.rel (%p158_p3) target bundleno = 344 (0x158), region = 32 }
   0xc   : > { %v1331_v0 = vld [vmem:[%s1986_s1 + $0x8] sm:$0xf]  ;;  %v1587_v1 = vld [vmem:[%s1986_s1 + $0x8] sm:$0x30]  ;;  %vm415_vm0 = vcmask 1045504   ;;  %s1994_s12 = smov (!%p190_p4, %s1648_s12), 1 }
   0xd   : > { %v1332_v2 = vor.u32 %v1587_v1, %v1331_v0  ;;  %v1415_v3 = vld [vmem:[%s1986_s1] sm:$0xf]  ;;  %v1570_v4 = vld [vmem:[%s1986_s1] sm:$0x30]  ;;  %v1533_v5 = vld [vmem:[%s1986_s1 + $0x10] sm:$0xf] }
   0xe   : > { %v1416_v6 = vor.u32 %v1570_v4, %v1415_v3  ;;  %v1604_v7 = vld [vmem:[%s1986_s1 + $0x10] sm:$0x30]  ;;  %s1608_s28 = smul.u32 144, %s1994_s12  ;;  %vm366_vm1 = vcmask 97280   ;;  %v1802_v52 = vld [vmem:[%s1987_s2] ss:$0 sm:$0xff] }
   0xf   : > { %v417_v8 = vsel %vm415_vm0, %v1332_v2, 0  ;;  %v1534_v9 = vor.u32 %v1604_v7, %v1533_v5  ;;  %s1553_s7 = sshll.u32 %s1994_s12, 8  ;;  %vm1094_vm2 = vcmask 64512  }
  0x10   : > { %426 = vmatpush.bf16.msra.mxu0 %v417_v8  ;;  %1605 = vmatpush.bf16.msra.mxu3 %v417_v8  ;;  %v642_v10 = vsel %vm415_vm0, %v1416_v6, 0  ;;  %s1723_s4 = scalar_lea.vmem %s1985_s0, %s1608_s28  ;;  %s1809_s10 = scalar_lea.vmem %s1988_s3, %s1553_s7 }
  0x11   : > { %651 = vmatpush.bf16.msra.mxu1 %v642_v10  ;;  %v903_v11 = vsel %vm415_vm0, %v1534_v9, 0  ;;  %v1571_v12 = vld [vmem:[%s1723_s4 + $0x8] sm:$0xff]  ;;  %v1554_v14 = vld [vmem:[%s1723_s4] sm:$0xff]  ;;  %v1588_v15 = vld [vmem:[%s1723_s4 + $0x10] sm:$0xff] }
  0x12   : > { %912 = vmatpush.bf16.msra.mxu2 %v903_v11  ;;  %v1583_v13 = vld [vmem:[%s1723_s4 + $0x68] sm:$0xff]  ;;  %v1572_v16 = vld [vmem:[%s1723_s4 + $0x10] sm:$0xff]  ;;  %v1589_v19 = vld [vmem:[%s1723_s4 + $0x18] sm:$0xff] }
  0x13   : > { %1333 = vmatmul.msk.bf16.vlgmr.msra.gmra.mxu0 %vm366_vm1, %v1571_v12  ;;  %1345 = vmatmul.msk.bf16.vlgmr.msra.gmra.mxu3 %vm366_vm1, %v1583_v13  ;;  %v1584_v17 = vld [vmem:[%s1723_s4 + $0x70] sm:$0xff]  ;;  %v1555_v18 = vld [vmem:[%s1723_s4 + $0x8] sm:$0xff]  ;;  %v1573_v20 = vld [vmem:[%s1723_s4 + $0x18] sm:$0xff] }
  0x14   : > { %1606 = vmatpush.bf16.msrb.mxu3 %v642_v10  ;;  %1417 = vmatmul.msk.bf16.vlgmr.msra.gmra.mxu1 %vm366_vm1, %v1554_v14  ;;  %v1585_v21 = vld [vmem:[%s1723_s4 + $0x78] sm:$0xff]  ;;  %v1556_v22 = vld [vmem:[%s1723_s4 + $0x10] sm:$0xff]  ;;  %v1590_v23 = vld [vmem:[%s1723_s4 + $0x20] sm:$0xff] }
  0x15   : > { %1535 = vmatmul.msk.bf16.vlgmr.msra.gmra.mxu2 %vm366_vm1, %v1588_v15  ;;  %v1574_v24 = vld [vmem:[%s1723_s4 + $0x20] sm:$0xff]  ;;  %v1557_v26 = vld [vmem:[%s1723_s4 + $0x18] sm:$0xff]  ;;  %v1591_v27 = vld [vmem:[%s1723_s4 + $0x28] sm:$0xff] }
  0x16   : > { %v1586_v25 = vld [vmem:[%s1723_s4 + $0x80] sm:$0xff]  ;;  %v1575_v28 = vld [vmem:[%s1723_s4 + $0x28] sm:$0xff]  ;;  %v1592_v31 = vld [vmem:[%s1723_s4 + $0x30] sm:$0xff] }
  0x17   : > { %v1566_v29 = vld [vmem:[%s1723_s4 + $0x60] sm:$0xff]  ;;  %v1576_v32 = vld [vmem:[%s1723_s4 + $0x30] sm:$0xff]  ;;  %v1567_v33 = vld [vmem:[%s1723_s4 + $0x68] sm:$0xff] }
  0x18   : > { %1607 = vmatpush.bf16.msra.mxu3 %v903_v11  ;;  %v1558_v30 = vld [vmem:[%s1723_s4 + $0x20] sm:$0xff]  ;;  %v1559_v34 = vld [vmem:[%s1723_s4 + $0x28] sm:$0xff]  ;;  %v1593_v35 = vld [vmem:[%s1723_s4 + $0x38] sm:$0xff] }
  0x19   : > { %v1577_v36 = vld [vmem:[%s1723_s4 + $0x38] sm:$0xff]  ;;  %v1568_v37 = vld [vmem:[%s1723_s4 + $0x70] sm:$0xff]  ;;  %v1594_v39 = vld [vmem:[%s1723_s4 + $0x40] sm:$0xff] }
  0x1a   : > { %v1560_v38 = vld [vmem:[%s1723_s4 + $0x30] sm:$0xff]  ;;  %v1578_v40 = vld [vmem:[%s1723_s4 + $0x40] sm:$0xff]  ;;  %v1569_v41 = vld [vmem:[%s1723_s4 + $0x78] sm:$0xff] }
  0x1b   : > { %v1561_v42 = vld [vmem:[%s1723_s4 + $0x38] sm:$0xff]  ;;  %v1595_v43 = vld [vmem:[%s1723_s4 + $0x48] sm:$0xff]  ;;  %v1600_v45 = vld [vmem:[%s1723_s4 + $0x70] sm:$0xff] }
  0x1c   : > { %v1579_v44 = vld [vmem:[%s1723_s4 + $0x48] sm:$0xff]  ;;  %v1562_v47 = vld [vmem:[%s1723_s4 + $0x40] sm:$0xff]  ;;  %v1596_v48 = vld [vmem:[%s1723_s4 + $0x50] sm:$0xff] }
  0x1d   : > { %v1580_v62 = vld [vmem:[%s1723_s4 + $0x50] sm:$0xff]  ;;  %v1601_v63 = vld [vmem:[%s1723_s4 + $0x78] sm:$0xff]  ;;  %v1563_v2 = vld [vmem:[%s1723_s4 + $0x48] sm:$0xff] }
  0x1e   : > { %v1597_v3 = vld [vmem:[%s1723_s4 + $0x58] sm:$0xff] }
  0x23   : > { %1334 = vmatmul.msk.bf16.gmra.mxu0 %vm366_vm1, %v1572_v16  ;;  %1346 = vmatmul.msk.bf16.gmra.mxu3 %vm366_vm1, %v1584_v17 }
  0x24   : > { %1418 = vmatmul.msk.bf16.gmra.mxu1 %vm366_vm1, %v1555_v18  ;;  %v1581_v18 = vld [vmem:[%s1723_s4 + $0x58] sm:$0xff] }
  0x25   : > { %1536 = vmatmul.msk.bf16.gmra.mxu2 %vm366_vm1, %v1589_v19  ;;  %v1602_v19 = vld [vmem:[%s1723_s4 + $0x80] sm:$0xff] }
  0x33   : > { %1335 = vmatmul.msk.bf16.gmra.mxu0 %vm366_vm1, %v1573_v20  ;;  %1347 = vmatmul.msk.bf16.gmra.mxu3 %vm366_vm1, %v1585_v21 }
  0x34   : > { %1419 = vmatmul.msk.bf16.gmra.mxu1 %vm366_vm1, %v1556_v22  ;;  %v1564_v22 = vld [vmem:[%s1723_s4 + $0x50] sm:$0xff] }
  0x35   : > { %1537 = vmatmul.msk.bf16.gmra.mxu2 %vm366_vm1, %v1590_v23  ;;  %v1598_v23 = vld [vmem:[%s1723_s4 + $0x60] sm:$0xff] }
  0x43   : > { %1336 = vmatmul.msk.bf16.gmra.mxu0 %vm366_vm1, %v1574_v24  ;;  %1348 = vmatmul.msk.bf16.gmra.mxu3 %vm366_vm1, %v1586_v25 }
  0x44   : > { %1420 = vmatmul.msk.bf16.gmra.mxu1 %vm366_vm1, %v1557_v26 }
  0x45   : > { %1538 = vmatmul.msk.bf16.gmra.mxu2 %vm366_vm1, %v1591_v27 }
  0x53   : > { %1337 = vmatmul.msk.bf16.gmra.mxu0 %vm366_vm1, %v1575_v28  ;;  %1429 = vmatmul.msk.bf16.vlgmr.msrb.gmra.mxu3 %vm366_vm1, %v1566_v29 }
  0x54   : > { %1421 = vmatmul.msk.bf16.gmra.mxu1 %vm366_vm1, %v1558_v30 }
  0x55   : > { %1539 = vmatmul.msk.bf16.gmra.mxu2 %vm366_vm1, %v1592_v31 }
  0x63   : > { %1338 = vmatmul.msk.bf16.gmra.mxu0 %vm366_vm1, %v1576_v32  ;;  %1430 = vmatmul.msk.bf16.gmra.mxu3 %vm366_vm1, %v1567_v33 }
  0x64   : > { %1422 = vmatmul.msk.bf16.gmra.mxu1 %vm366_vm1, %v1559_v34 }
  0x65   : > { %1540 = vmatmul.msk.bf16.gmra.mxu2 %vm366_vm1, %v1593_v35 }
  0x73   : > { %1339 = vmatmul.msk.bf16.gmra.mxu0 %vm366_vm1, %v1577_v36  ;;  %1431 = vmatmul.msk.bf16.gmra.mxu3 %vm366_vm1, %v1568_v37 }
  0x74   : > { %1423 = vmatmul.msk.bf16.gmra.mxu1 %vm366_vm1, %v1560_v38  ;;  %v1582_v38 = vld [vmem:[%s1723_s4 + $0x60] sm:$0xff] }
  0x75   : > { %1541 = vmatmul.msk.bf16.gmra.mxu2 %vm366_vm1, %v1594_v39  ;;  %v1603_v39 = vld [vmem:[%s1723_s4 + $0x88] sm:$0xff] }
  0x83   : > { %1340 = vmatmul.msk.bf16.gmra.mxu0 %vm366_vm1, %v1578_v40  ;;  %1432 = vmatmul.msk.bf16.gmra.mxu3 %vm366_vm1, %v1569_v41 }
  0x84   : > { %1424 = vmatmul.msk.bf16.gmra.mxu1 %vm366_vm1, %v1561_v42  ;;  %v1565_v42 = vld [vmem:[%s1723_s4 + $0x58] sm:$0xff] }
  0x85   : > { %1542 = vmatmul.msk.bf16.gmra.mxu2 %vm366_vm1, %v1595_v43  ;;  %v1599_v43 = vld [vmem:[%s1723_s4 + $0x68] sm:$0xff] }
  0x90   : > { %v428_v46 = vpop.f32.mrf.mxu0 }
  0x91   : > { %v653_v49 = vpop.f32.mrf.mxu1 }
  0x92   : > { %v654_v50 = vadd.f32 %v653_v49, %v428_v46 }
  0x93   : > { %1341 = vmatmul.msk.bf16.gmra.mxu0 %vm366_vm1, %v1579_v44  ;;  %1547 = vmatmul.msk.bf16.vlgmr.msra.gmra.mxu3 %vm366_vm1, %v1600_v45 }
  0x94   : > { %1425 = vmatmul.msk.bf16.gmra.mxu1 %vm366_vm1, %v1562_v47 }
  0x95   : > { %1543 = vmatmul.msk.bf16.gmra.mxu2 %vm366_vm1, %v1596_v48 }
  0x96   : > { %v1797_v51 = vpop.f32.mrf.mxu3 }
  0x98   : > { %v914_v53 = vpop.f32.mrf.mxu2  ;;  %v430_v55 = vpop.f32.mrf.mxu0 }
  0x99   : > { %v994_v54 = vadd.f32 %v914_v53, %v654_v50  ;;  %v655_v56 = vpop.f32.mrf.mxu1 }
  0x9a   : > { %v656_v59 = vadd.f32 %v655_v56, %v430_v55 }
  0x9b   : > { %v1030_v57 = vadd.f32 %v1802_v52, %v994_v54 }
  0x9d   : > { %v1062_v58 = vmax.f32 %v1030_v57, 0.0 }
  0x9e   : > { %v1813_v60 = vpop.f32.mrf.mxu3 }
  0x9f   : > { %1095 = vst.msk [vmem:[%s1809_s10] sm:$0xff] %vm1094_vm2, %v1062_v58 }
  0xa0   : > { %v916_v61 = vpop.f32.mrf.mxu2  ;;  %v433_v1 = vpop.f32.mrf.mxu0 }
  0xa1   : > { %v995_v0 = vadd.f32 %v916_v61, %v656_v59  ;;  %v658_v4 = vpop.f32.mrf.mxu1 }
  0xa2   : > { %v659_v7 = vadd.f32 %v658_v4, %v433_v1 }
  0xa3   : > { %v1031_v5 = vadd.f32 %v1802_v52, %v995_v0  ;;  %1342 = vmatmul.msk.bf16.gmra.mxu0 %vm366_vm1, %v1580_v62  ;;  %1548 = vmatmul.msk.bf16.gmra.mxu3 %vm366_vm1, %v1601_v63 }
  0xa4   : > { %1426 = vmatmul.msk.bf16.gmra.mxu1 %vm366_vm1, %v1563_v2 }
  0xa5   : > { %v1063_v6 = vmax.f32 %v1031_v5, 0.0  ;;  %1544 = vmatmul.msk.bf16.gmra.mxu2 %vm366_vm1, %v1597_v3 }
  0xa6   : > { %v1826_v8 = vpop.f32.mrf.mxu3 }
  0xa7   : > { %1096 = vst.msk [vmem:[%s1809_s10 + $0x8] sm:$0xff] %vm1094_vm2, %v1063_v6 }
  0xa8   : > { %v919_v9 = vpop.f32.mrf.mxu2  ;;  %v435_v11 = vpop.f32.mrf.mxu0 }
  0xa9   : > { %v996_v10 = vadd.f32 %v919_v9, %v659_v7  ;;  %v660_v12 = vpop.f32.mrf.mxu1 }
  0xaa   : > { %v661_v15 = vadd.f32 %v660_v12, %v435_v11 }
  0xab   : > { %v1032_v13 = vadd.f32 %v1802_v52, %v996_v10 }
  0xad   : > { %v1064_v14 = vmax.f32 %v1032_v13, 0.0 }
  0xae   : > { %v1831_v16 = vpop.f32.mrf.mxu3 }
  0xaf   : > { %1097 = vst.msk [vmem:[%s1809_s10 + $0x10] sm:$0xff] %vm1094_vm2, %v1064_v14 }
  0xb0   : > { %v921_v17 = vpop.f32.mrf.mxu2  ;;  %v438_v21 = vpop.f32.mrf.mxu0 }
  0xb1   : > { %v997_v20 = vadd.f32 %v921_v17, %v661_v15  ;;  %v663_v24 = vpop.f32.mrf.mxu1 }
  0xb2   : > { %v664_v27 = vadd.f32 %v663_v24, %v438_v21 }
  0xb3   : > { %v1033_v25 = vadd.f32 %v1802_v52, %v997_v20  ;;  %1343 = vmatmul.msk.bf16.gmra.mxu0 %vm366_vm1, %v1581_v18  ;;  %1549 = vmatmul.msk.bf16.gmra.mxu3 %vm366_vm1, %v1602_v19 }
  0xb4   : > { %1427 = vmatmul.msk.bf16.gmra.mxu1 %vm366_vm1, %v1564_v22 }
  0xb5   : > { %v1065_v26 = vmax.f32 %v1033_v25, 0.0  ;;  %1545 = vmatmul.msk.bf16.gmra.mxu2 %vm366_vm1, %v1598_v23 }
  0xb6   : > { %v1844_v28 = vpop.f32.mrf.mxu3 }
  0xb7   : > { %1098 = vst.msk [vmem:[%s1809_s10 + $0x18] sm:$0xff] %vm1094_vm2, %v1065_v26 }
  0xb8   : > { %v924_v29 = vpop.f32.mrf.mxu2  ;;  %v440_v31 = vpop.f32.mrf.mxu0 }
  0xb9   : > { %v998_v30 = vadd.f32 %v924_v29, %v664_v27  ;;  %v665_v32 = vpop.f32.mrf.mxu1 }
  0xba   : > { %v666_v35 = vadd.f32 %v665_v32, %v440_v31 }
  0xbb   : > { %v1034_v33 = vadd.f32 %v1802_v52, %v998_v30 }
  0xbd   : > { %v1066_v34 = vmax.f32 %v1034_v33, 0.0 }
  0xbe   : > { %v1849_v36 = vpop.f32.mrf.mxu3 }
  0xbf   : > { %1099 = vst.msk [vmem:[%s1809_s10 + $0x20] sm:$0xff] %vm1094_vm2, %v1066_v34 }
  0xc0   : > { %v926_v37 = vpop.f32.mrf.mxu2  ;;  %v443_v41 = vpop.f32.mrf.mxu0 }
  0xc1   : > { %v999_v40 = vadd.f32 %v926_v37, %v666_v35  ;;  %v668_v44 = vpop.f32.mrf.mxu1 }
  0xc2   : > { %v669_v47 = vadd.f32 %v668_v44, %v443_v41 }
  0xc3   : > { %v1035_v45 = vadd.f32 %v1802_v52, %v999_v40  ;;  %1344 = vmatmul.msk.bf16.gmra.mxu0 %vm366_vm1, %v1582_v38  ;;  %1550 = vmatmul.msk.bf16.gmra.mxu3 %vm366_vm1, %v1603_v39 }
  0xc4   : > { %1428 = vmatmul.msk.bf16.gmra.mxu1 %vm366_vm1, %v1565_v42 }
  0xc5   : > { %v1067_v46 = vmax.f32 %v1035_v45, 0.0  ;;  %1546 = vmatmul.msk.bf16.gmra.mxu2 %vm366_vm1, %v1599_v43 }
  0xc6   : > { %v1862_v48 = vpop.f32.mrf.mxu3 }
  0xc7   : > { %1100 = vst.msk [vmem:[%s1809_s10 + $0x28] sm:$0xff] %vm1094_vm2, %v1067_v46 }
  0xc8   : > { %v929_v49 = vpop.f32.mrf.mxu2  ;;  %v445_v53 = vpop.f32.mrf.mxu0 }
  0xc9   : > { %v1000_v50 = vadd.f32 %v929_v49, %v669_v47  ;;  %v670_v54 = vpop.f32.mrf.mxu1 }
  0xca   : > { %v671_v57 = vadd.f32 %v670_v54, %v445_v53 }
  0xcb   : > { %v1036_v55 = vadd.f32 %v1802_v52, %v1000_v50 }
  0xcd   : > { %v1068_v56 = vmax.f32 %v1036_v55, 0.0 }
  0xce   : > { %v1867_v58 = vpop.f32.mrf.mxu3 }
  0xcf   : > { %1101 = vst.msk [vmem:[%s1809_s10 + $0x30] sm:$0xff] %vm1094_vm2, %v1068_v56 }
  0xd0   : > { %v931_v59 = vpop.f32.mrf.mxu2  ;;  %v448_v62 = vpop.f32.mrf.mxu0 }
  0xd1   : > { %v1001_v61 = vadd.f32 %v931_v59, %v671_v57  ;;  %v673_v63 = vpop.f32.mrf.mxu1 }
  0xd2   : > { %v674_v2 = vadd.f32 %v673_v63, %v448_v62 }
  0xd3   : > { %v1037_v0 = vadd.f32 %v1802_v52, %v1001_v61 }
  0xd5   : > { %v1069_v1 = vmax.f32 %v1037_v0, 0.0 }
  0xd6   : > { %v1872_v3 = vpop.f32.mrf.mxu3 }
  0xd7   : > { %1102 = vst.msk [vmem:[%s1809_s10 + $0x38] sm:$0xff] %vm1094_vm2, %v1069_v1 }
  0xd8   : > { %v934_v4 = vpop.f32.mrf.mxu2  ;;  %v450_v6 = vpop.f32.mrf.mxu0 }
  0xd9   : > { %v1002_v5 = vadd.f32 %v934_v4, %v674_v2  ;;  %v675_v7 = vpop.f32.mrf.mxu1 }
  0xda   : > { %v676_v11 = vadd.f32 %v675_v7, %v450_v6 }
  0xdb   : > { %v1038_v9 = vadd.f32 %v1802_v52, %v1002_v5 }
  0xdd   : > { %v1070_v10 = vmax.f32 %v1038_v9, 0.0 }
  0xde   : > { %v1877_v12 = vpop.f32.mrf.mxu3 }
  0xdf   : > { %1103 = vst.msk [vmem:[%s1809_s10 + $0x40] sm:$0xff] %vm1094_vm2, %v1070_v10 }
  0xe0   : > { %v936_v13 = vpop.f32.mrf.mxu2  ;;  %v453_v15 = vpop.f32.mrf.mxu0 }
  0xe1   : > { %v1003_v14 = vadd.f32 %v936_v13, %v676_v11  ;;  %v678_v17 = vpop.f32.mrf.mxu1 }
  0xe2   : > { %v679_v20 = vadd.f32 %v678_v17, %v453_v15  ;;  %v714_v15 = vadd.f32 %v1872_v3, %v1797_v51 }
  0xe3   : > { %v1039_v18 = vadd.f32 %v1802_v52, %v1003_v14 }
  0xe5   : > { %v1071_v19 = vmax.f32 %v1039_v18, 0.0 }
  0xe6   : > { %v1882_v21 = vpop.f32.mrf.mxu3 }
  0xe7   : > { %1104 = vst.msk [vmem:[%s1809_s10 + $0x48] sm:$0xff] %vm1094_vm2, %v1071_v19 }
  0xe8   : > { %v939_v22 = vpop.f32.mrf.mxu2  ;;  %v455_v24 = vpop.f32.mrf.mxu0 }
  0xe9   : > { %v1004_v23 = vadd.f32 %v939_v22, %v679_v20  ;;  %v680_v25 = vpop.f32.mrf.mxu1 }
  0xea   : > { %v681_v29 = vadd.f32 %v680_v25, %v455_v24 }
  0xeb   : > { %v1040_v26 = vadd.f32 %v1802_v52, %v1004_v23 }
  0xed   : > { %v1072_v27 = vmax.f32 %v1040_v26, 0.0 }
  0xee   : > { %v1887_v30 = vpop.f32.mrf.mxu3 }
  0xef   : > { %1105 = vst.msk [vmem:[%s1809_s10 + $0x50] sm:$0xff] %vm1094_vm2, %v1072_v27 }
  0xf0   : > { %v941_v31 = vpop.f32.mrf.mxu2  ;;  %v458_v33 = vpop.f32.mrf.mxu0 }
  0xf1   : > { %v1005_v32 = vadd.f32 %v941_v31, %v681_v29  ;;  %v683_v34 = vpop.f32.mrf.mxu1  ;;  %v716_v29 = vadd.f32 %v1877_v12, %v1813_v60  ;;  %v719_v12 = vadd.f32 %v1882_v21, %v1826_v8 }
  0xf2   : > { %v684_v38 = vadd.f32 %v683_v34, %v458_v33 }
  0xf3   : > { %v1041_v35 = vadd.f32 %v1802_v52, %v1005_v32 }
  0xf5   : > { %v1073_v37 = vmax.f32 %v1041_v35, 0.0 }
  0xf6   : > { %v1892_v39 = vpop.f32.mrf.mxu3 }
  0xf7   : > { %1106 = vst.msk [vmem:[%s1809_s10 + $0x58] sm:$0xff] %vm1094_vm2, %v1073_v37 }
  0xf8   : > { %v944_v40 = vpop.f32.mrf.mxu2  ;;  %v460_v42 = vpop.f32.mrf.mxu0 }
  0xf9   : > { %v1006_v41 = vadd.f32 %v944_v40, %v684_v38  ;;  %v685_v43 = vpop.f32.mrf.mxu1 }
  0xfa   : > { %v686_v46 = vadd.f32 %v685_v43, %v460_v42 }
  0xfb   : > { %v1042_v44 = vadd.f32 %v1802_v52, %v1006_v41 }
  0xfd   : > { %v1074_v45 = vmax.f32 %v1042_v44, 0.0 }
  0xfe   : > { %v1897_v47 = vpop.f32.mrf.mxu3 }
  0xff   : > { %1107 = vst.msk [vmem:[%s1809_s10 + $0x60] sm:$0xff] %vm1094_vm2, %v1074_v45 }
 0x100   : > { %v946_v49 = vpop.f32.mrf.mxu2  ;;  %v463_v53 = vpop.f32.mrf.mxu0 }
 0x101   : > { %v1007_v50 = vadd.f32 %v946_v49, %v686_v46  ;;  %v688_v54 = vpop.f32.mrf.mxu1 }
 0x102   : > { %v689_v57 = vadd.f32 %v688_v54, %v463_v53 }
 0x103   : > { %v1043_v55 = vadd.f32 %v1802_v52, %v1007_v50 }
 0x105   : > { %v1075_v56 = vmax.f32 %v1043_v55, 0.0 }
 0x106   : > { %v1902_v59 = vpop.f32.mrf.mxu3 }
 0x107   : > { %1108 = vst.msk [vmem:[%s1809_s10 + $0x68] sm:$0xff] %vm1094_vm2, %v1075_v56  ;;  %v721_v56 = vadd.f32 %v1887_v30, %v1831_v16  ;;  %v724_v30 = vadd.f32 %v1892_v39, %v1844_v28 }
 0x108   : > { %v949_v61 = vpop.f32.mrf.mxu2  ;;  %v465_v63 = vpop.f32.mrf.mxu0 }
 0x109   : > { %v1008_v62 = vadd.f32 %v949_v61, %v689_v57  ;;  %v690_v0 = vpop.f32.mrf.mxu1 }
 0x10a   : > { %v691_v4 = vadd.f32 %v690_v0, %v465_v63 }
 0x10b   : > { %v1044_v1 = vadd.f32 %v1802_v52, %v1008_v62 }
 0x10d   : > { %v1076_v2 = vmax.f32 %v1044_v1, 0.0 }
 0x10e   : > { %v1907_v5 = vpop.f32.mrf.mxu3 }
 0x10f   : > { %1109 = vst.msk [vmem:[%s1809_s10 + $0x70] sm:$0xff] %vm1094_vm2, %v1076_v2 }
 0x110   : > { %v951_v6 = vpop.f32.mrf.mxu2  ;;  %v468_v9 = vpop.f32.mrf.mxu0 }
 0x111   : > { %v1009_v7 = vadd.f32 %v951_v6, %v691_v4  ;;  %v693_v10 = vpop.f32.mrf.mxu1 }
 0x112   : > { %v694_v14 = vadd.f32 %v693_v10, %v468_v9 }
 0x113   : > { %v1045_v11 = vadd.f32 %v1802_v52, %v1009_v7 }
 0x115   : > { %v1077_v13 = vmax.f32 %v1045_v11, 0.0 }
 0x116   : > { %v974_v17 = vpop.f32.mrf.mxu3 }
 0x117   : > { %1110 = vst.msk [vmem:[%s1809_s10 + $0x78] sm:$0xff] %vm1094_vm2, %v1077_v13  ;;  %v1018_v19 = vadd.f32 %v974_v17, %v714_v15 }
 0x118   : > { %v954_v18 = vpop.f32.mrf.mxu2  ;;  %v470_v22 = vpop.f32.mrf.mxu0 }
 0x119   : > { %v1010_v20 = vadd.f32 %v954_v18, %v694_v14  ;;  %v1054_v23 = vadd.f32 %v1802_v52, %v1018_v19  ;;  %v695_v24 = vpop.f32.mrf.mxu1 }
 0x11a   : > { %v696_v51 = vadd.f32 %v695_v24, %v470_v22 }
 0x11b   : > { %v1046_v25 = vadd.f32 %v1802_v52, %v1010_v20  ;;  %v1086_v26 = vmax.f32 %v1054_v23, 0.0  ;;  %v726_v20 = vadd.f32 %v1897_v47, %v1849_v36  ;;  %v729_v47 = vadd.f32 %v1902_v59, %v1862_v48 }
 0x11c   : > { %v731_v48 = vadd.f32 %v1907_v5, %v1867_v58 }
 0x11d   : > { %v1078_v27 = vmax.f32 %v1046_v25, 0.0  ;;  %1119 = vst.msk [vmem:[%s1809_s10 + $0xc0] sm:$0xff] %vm1094_vm2, %v1086_v26 }
 0x11e   : > { %v976_v3 = vpop.f32.mrf.mxu3 }
 0x11f   : > { %1111 = vst.msk [vmem:[%s1809_s10 + $0x80] sm:$0xff] %vm1094_vm2, %v1078_v27  ;;  %v1019_v32 = vadd.f32 %v976_v3, %v716_v29 }
 0x120   : > { %v956_v31 = vpop.f32.mrf.mxu2  ;;  %v473_v34 = vpop.f32.mrf.mxu0 }
 0x121   : > { %v1011_v33 = vadd.f32 %v956_v31, %v696_v51  ;;  %v1055_v35 = vadd.f32 %v1802_v52, %v1019_v32  ;;  %v698_v37 = vpop.f32.mrf.mxu1 }
 0x122   : > { %v699_v60 = vadd.f32 %v698_v37, %v473_v34 }
 0x123   : > { %v1047_v38 = vadd.f32 %v1802_v52, %v1011_v33  ;;  %v1087_v40 = vmax.f32 %v1055_v35, 0.0 }
 0x125   : > { %v1079_v41 = vmax.f32 %v1047_v38, 0.0  ;;  %1120 = vst.msk [vmem:[%s1809_s10 + $0xc8] sm:$0xff] %vm1094_vm2, %v1087_v40 }
 0x126   : > { %v979_v42 = vpop.f32.mrf.mxu3 }
 0x127   : > { %1112 = vst.msk [vmem:[%s1809_s10 + $0x88] sm:$0xff] %vm1094_vm2, %v1079_v41  ;;  %v1020_v44 = vadd.f32 %v979_v42, %v719_v12 }
 0x128   : > { %v959_v43 = vpop.f32.mrf.mxu2  ;;  %v475_v46 = vpop.f32.mrf.mxu0 }
 0x129   : > { %v1012_v45 = vadd.f32 %v959_v43, %v699_v60  ;;  %v1056_v49 = vadd.f32 %v1802_v52, %v1020_v44  ;;  %v700_v50 = vpop.f32.mrf.mxu1 }
 0x12a   : > { %v701_v8 = vadd.f32 %v700_v50, %v475_v46 }
 0x12b   : > { %v1048_v53 = vadd.f32 %v1802_v52, %v1012_v45  ;;  %v1088_v54 = vmax.f32 %v1056_v49, 0.0 }
 0x12d   : > { %v1080_v55 = vmax.f32 %v1048_v53, 0.0  ;;  %1121 = vst.msk [vmem:[%s1809_s10 + $0xd0] sm:$0xff] %vm1094_vm2, %v1088_v54 }
 0x12e   : > { %v981_v21 = vpop.f32.mrf.mxu3 }
 0x12f   : > { %1113 = vst.msk [vmem:[%s1809_s10 + $0x90] sm:$0xff] %vm1094_vm2, %v1080_v55  ;;  %v1021_v61 = vadd.f32 %v981_v21, %v721_v56 }
 0x130   : > { %v961_v57 = vpop.f32.mrf.mxu2  ;;  %v478_v63 = vpop.f32.mrf.mxu0 }
 0x131   : > { %v1013_v62 = vadd.f32 %v961_v57, %v701_v8  ;;  %v1057_v0 = vadd.f32 %v1802_v52, %v1021_v61  ;;  %v703_v1 = vpop.f32.mrf.mxu1 }
 0x132   : > { %v704_v16 = vadd.f32 %v703_v1, %v478_v63 }
 0x133   : > { %v1049_v2 = vadd.f32 %v1802_v52, %v1013_v62  ;;  %v1089_v4 = vmax.f32 %v1057_v0, 0.0 }
 0x135   : > { %v1081_v6 = vmax.f32 %v1049_v2, 0.0  ;;  %1122 = vst.msk [vmem:[%s1809_s10 + $0xd8] sm:$0xff] %vm1094_vm2, %v1089_v4 }
 0x136   : > { %v984_v7 = vpop.f32.mrf.mxu3 }
 0x137   : > { %1114 = vst.msk [vmem:[%s1809_s10 + $0x98] sm:$0xff] %vm1094_vm2, %v1081_v6  ;;  %v1022_v10 = vadd.f32 %v984_v7, %v724_v30 }
 0x138   : > { %v964_v9 = vpop.f32.mrf.mxu2  ;;  %v480_v13 = vpop.f32.mrf.mxu0 }
 0x139   : > { %v1014_v11 = vadd.f32 %v964_v9, %v704_v16  ;;  %v1058_v14 = vadd.f32 %v1802_v52, %v1022_v10  ;;  %v705_v15 = vpop.f32.mrf.mxu1 }
 0x13a   : > { %v706_v28 = vadd.f32 %v705_v15, %v480_v13 }
 0x13b   : > { %v1050_v17 = vadd.f32 %v1802_v52, %v1014_v11  ;;  %v1090_v18 = vmax.f32 %v1058_v14, 0.0 }
 0x13d   : > { %v1082_v19 = vmax.f32 %v1050_v17, 0.0  ;;  %1123 = vst.msk [vmem:[%s1809_s10 + $0xe0] sm:$0xff] %vm1094_vm2, %v1090_v18 }
 0x13e   : > { %v986_v39 = vpop.f32.mrf.mxu3 }
 0x13f   : > { %1115 = vst.msk [vmem:[%s1809_s10 + $0xa0] sm:$0xff] %vm1094_vm2, %v1082_v19  ;;  %v1023_v23 = vadd.f32 %v986_v39, %v726_v20 }
 0x140   : > { %v966_v22 = vpop.f32.mrf.mxu2  ;;  %v483_v26 = vpop.f32.mrf.mxu0 }
 0x141   : > { %v1015_v24 = vadd.f32 %v966_v22, %v706_v28  ;;  %v1059_v25 = vadd.f32 %v1802_v52, %v1023_v23  ;;  %v708_v27 = vpop.f32.mrf.mxu1 }
 0x142   : > { %v709_v36 = vadd.f32 %v708_v27, %v483_v26 }
 0x143   : > { %v1051_v29 = vadd.f32 %v1802_v52, %v1015_v24  ;;  %v1091_v51 = vmax.f32 %v1059_v25, 0.0 }
 0x145   : > { %v1083_v3 = vmax.f32 %v1051_v29, 0.0  ;;  %1124 = vst.msk [vmem:[%s1809_s10 + $0xe8] sm:$0xff] %vm1094_vm2, %v1091_v51 }
 0x146   : > { %v989_v31 = vpop.f32.mrf.mxu3 }
 0x147   : > { %1116 = vst.msk [vmem:[%s1809_s10 + $0xa8] sm:$0xff] %vm1094_vm2, %v1083_v3  ;;  %v1024_v33 = vadd.f32 %v989_v31, %v729_v47 }
 0x148   : > { %v969_v32 = vpop.f32.mrf.mxu2  ;;  %v485_v40 = vpop.f32.mrf.mxu0 }
 0x149   : > { %v1016_v34 = vadd.f32 %v969_v32, %v709_v36  ;;  %v1060_v35 = vadd.f32 %v1802_v52, %v1024_v33  ;;  %v710_v41 = vpop.f32.mrf.mxu1 }
 0x14a   : > { %v711_v59 = vadd.f32 %v710_v41, %v485_v40 }
 0x14b   : > { %v1052_v37 = vadd.f32 %v1802_v52, %v1016_v34  ;;  %v1092_v38 = vmax.f32 %v1060_v35, 0.0 }
 0x14d   : > { %v1084_v60 = vmax.f32 %v1052_v37, 0.0  ;;  %1125 = vst.msk [vmem:[%s1809_s10 + $0xf0] sm:$0xff] %vm1094_vm2, %v1092_v38 }
 0x14e   : > { %v991_v12 = vpop.f32.mrf.mxu3 }
 0x14f   : > { %1117 = vst.msk [vmem:[%s1809_s10 + $0xb0] sm:$0xff] %vm1094_vm2, %v1084_v60  ;;  %v1025_v43 = vadd.f32 %v991_v12, %v731_v48 }
 0x150   : > { %v971_v42 = vpop.f32.mrf.mxu2 }
 0x151   : > { %v1017_v44 = vadd.f32 %v971_v42, %v711_v59  ;;  %v1061_v45 = vadd.f32 %v1802_v52, %v1025_v43 }
 0x153   : > { %v1053_v46 = vadd.f32 %v1802_v52, %v1017_v44  ;;  %v1093_v49 = vmax.f32 %v1061_v45, 0.0 }
 0x155   : > { %v1085_v50 = vmax.f32 %v1053_v46, 0.0  ;;  %1126 = vst.msk [vmem:[%s1809_s10 + $0xf8] sm:$0xff] %vm1094_vm2, %v1093_v49 }
 0x157   : > { %1118 = vst.msk [vmem:[%s1809_s10 + $0xb8] sm:$0xff] %vm1094_vm2, %v1085_v50 }
 0x158 PF: > { %s13_s14 = sadd.s32 1, %s1656_s14   ;;  %s1989_s12 = smov %s1652_s13 }
 0x159   : > { %p10_p5 = scmp.ge.s32.totalorder %s13_s14, 4   ;;  %s1990_s13 = smov %s1992_s15 }
 0x15b   :  { %12 = sbr.rel (!%p10_p5) target bundleno = 2 (0x2), region = 66 }

</bundles_post_ra>
